<compile_context>
chip_gen: v7x
topology: tpu7x:2x2x1
jax: 0.10.0
libtpu: 0.0.40
codegen_flags: <defaults>
</compile_context>

<pallas_src>
import functools

import jax
import jax.numpy as jnp
from jax import lax
from jax.experimental import pallas as pl
from jax.experimental.pallas import tpu as pltpu

_EPS = 1e-8  # same eps as torch.nn.CosineSimilarity default


def _round_up(n, m):
    return ((n + m - 1) // m) * m


def _cosine_sim_kernel(x_ref, y_ref, o_ref, *, inv_temp):
    x = x_ref[...]                               # (TM, H), native dtype
    y = y_ref[...]                               # (TN, H), native dtype
    xf = x.astype(jnp.float32)
    yf = y.astype(jnp.float32)

    # Row-wise squared norms.  Clamping each squared norm at eps means each
    # norm >= sqrt(eps), so the product ||x||*||y|| >= eps — this matches
    # torch's max(||x||*||y||, eps) for all but near-zero vectors.
    x_sq = jnp.maximum(jnp.sum(xf * xf, axis=-1, keepdims=True), _EPS)  # (TM, 1)
    y_sq = jnp.maximum(jnp.sum(yf * yf, axis=-1, keepdims=True), _EPS)  # (TN, 1)

    # Inverse norms on the EUP; fold 1/temp into the tiny (TM, 1) vector
    # rather than scaling the (TM, TN) output.
    inv_x = lax.rsqrt(x_sq) * inv_temp
    inv_y = lax.rsqrt(y_sq)

    # Normalize before the matmul; cast back to the input dtype so bf16
    # operands feed the MXU natively (f32 accumulation below).
    xs = (xf * inv_x).astype(x.dtype)
    ys = (yf * inv_y).astype(y.dtype)

    # NT matmul: contract the last (hidden) axes of both operands directly —
    # no in-kernel transpose / relayout before the MXU push.
    o_ref[...] = lax.dot_general(
        xs, ys,
        dimension_numbers=(((1,), (1,)), ((), ())),
        preferred_element_type=jnp.float32,
    ).astype(o_ref.dtype)


def similarity(x, y, temp):
    """Pallas implementation of Similarity.forward(x, y).

    Accepts x of shape (B, 1, H) and y of shape (1, B, H) (the SimCSE usage),
    or plain (Bx, H) / (By, H).  Returns a (Bx, By) similarity matrix:
        out[i, j] = cos(x[i], y[j]) / temp
    """
    # Glue: collapse the broadcast singleton dims down to 2-D rows.
    x2d = x.reshape(-1, x.shape[-1]) if x.ndim == 3 else x
    y2d = y.reshape(-1, y.shape[-1]) if y.ndim == 3 else y

    bx, h = x2d.shape
    by, _ = y2d.shape

    # Tile sizes: TM sublane-aligned (multiple of 8), TN lane-dense
    # (multiple of 128).  256 matches the v6e/v7x MXU; also fine on v5e.
    tm = min(256, _round_up(bx, 8))
    tn = min(256, _round_up(by, 128))

    bx_p = _round_up(bx, tm)
    by_p = _round_up(by, tn)
    if bx_p != bx:
        x2d = jnp.pad(x2d, ((0, bx_p - bx), (0, 0)))
    if by_p != by:
        y2d = jnp.pad(y2d, ((0, by_p - by), (0, 0)))

    grid = (bx_p // tm, by_p // tn)
    kernel = functools.partial(_cosine_sim_kernel, inv_temp=float(1.0 / temp))

    out = pl.pallas_call(
        kernel,
        out_shape=jax.ShapeDtypeStruct((bx_p, by_p), jnp.float32),
        grid_spec=pltpu.PrefetchScalarGridSpec(
            num_scalar_prefetch=0,
            grid=grid,
            in_specs=[
                pl.BlockSpec((tm, h), lambda i, j: (i, 0)),
                pl.BlockSpec((tn, h), lambda i, j: (j, 0)),
            ],
            out_specs=pl.BlockSpec((tm, tn), lambda i, j: (i, j)),
        ),
        compiler_params=pltpu.CompilerParams(
            dimension_semantics=("parallel", "parallel"),
            vmem_limit_bytes=32 * 1024 * 1024,  # fits v7x's smaller VMEM too
        ),
    )(x2d, y2d)

    return out[:bx, :by]


def _reference(x, y, temp):
    # Pure-JAX reference mirroring torch broadcasting semantics.
    xb, yb = jnp.broadcast_arrays(x, y)
    dot = jnp.sum(xb * yb, axis=-1)
    nx = jnp.linalg.norm(xb, axis=-1)
    ny = jnp.linalg.norm(yb, axis=-1)
    return dot / jnp.maximum(nx * ny, _EPS) / temp


if __name__ == "__main__":
    temp = 0.05  # Similarity(temp=0.05), the usual SimCSE temperature

    key = jax.random.PRNGKey(0)
    kx, ky = jax.random.split(key)
    B, H = 8, 32
    # SimCSE-style broadcast inputs: x (B, 1, H) vs y (1, B, H) -> (B, B)
    x = jax.random.normal(kx, (B, 1, H), dtype=jnp.float32)
    y = jax.random.normal(ky, (1, B, H), dtype=jnp.float32)

    out = similarity(x, y, temp)
    out = jax.block_until_ready(out)

    ref = _reference(x, y, temp)
    assert out.shape == (B, B), out.shape
    assert jnp.allclose(out, ref, atol=1e-4, rtol=1e-4), (
        "max abs err %g" % float(jnp.max(jnp.abs(out - ref)))
    )

    print("KERNEL_OK")
</pallas_src>

<mosaic_0001>
module attributes {stable_mosaic.version = 11 : i64} {
  func.func @_cosine_sim_kernel(%arg0: i32, %arg1: i32, %arg2: memref<8x32xf32, #tpu.memory_space<vmem>>, %arg3: memref<128x32xf32, #tpu.memory_space<vmem>>, %arg4: memref<8x128xf32, #tpu.memory_space<vmem>>) attributes {dimension_semantics = [#tpu.dimension_semantics<parallel>, #tpu.dimension_semantics<parallel>], iteration_bounds = array<i64: 1, 1>, scalar_prefetch = 0 : i64, scratch_operands = 0 : i64, tpu.core_type = #tpu.core_type<tc>, window_params = [{transform_indices = @transform_0, window_bounds = array<i64: 8, 32>}, {transform_indices = @transform_1, window_bounds = array<i64: 128, 32>}, {transform_indices = @transform_2, window_bounds = array<i64: 8, 128>}]} {
    %c0 = arith.constant 0 : index
    %c0_0 = arith.constant 0 : index
    %0 = vector.load %arg2[%c0, %c0_0] : memref<8x32xf32, #tpu.memory_space<vmem>>, vector<8x32xf32>
    %c0_1 = arith.constant 0 : index
    %c0_2 = arith.constant 0 : index
    %1 = vector.load %arg3[%c0_1, %c0_2] : memref<128x32xf32, #tpu.memory_space<vmem>>, vector<128x32xf32>
    %2 = arith.mulf %0, %0 : vector<8x32xf32>
    %cst = arith.constant dense<0.000000e+00> : vector<8xf32>
    %3 = vector.multi_reduction <add>, %2, %cst [1] : vector<8x32xf32> to vector<8xf32>
    %4 = vector.shape_cast %3 : vector<8xf32> to vector<8x1xf32>
    %cst_3 = arith.constant 9.99999993E-9 : f32
    %5 = vector.broadcast %cst_3 : f32 to vector<8x1xf32>
    %6 = arith.maximumf %4, %5 : vector<8x1xf32>
    %7 = arith.mulf %1, %1 : vector<128x32xf32>
    %cst_4 = arith.constant dense<0.000000e+00> : vector<128xf32>
    %8 = vector.multi_reduction <add>, %7, %cst_4 [1] : vector<128x32xf32> to vector<128xf32>
    %9 = vector.shape_cast %8 : vector<128xf32> to vector<128x1xf32>
    %cst_5 = arith.constant 9.99999993E-9 : f32
    %10 = vector.broadcast %cst_5 : f32 to vector<128x1xf32>
    %11 = arith.maximumf %9, %10 : vector<128x1xf32>
    %12 = math.rsqrt %6 : vector<8x1xf32>
    %cst_6 = arith.constant 2.000000e+01 : f32
    %13 = vector.broadcast %cst_6 : f32 to vector<8x1xf32>
    %14 = arith.mulf %12, %13 : vector<8x1xf32>
    %15 = math.rsqrt %11 : vector<128x1xf32>
    %16 = vector.broadcast %14 : vector<8x1xf32> to vector<8x32xf32>
    %17 = arith.mulf %0, %16 : vector<8x32xf32>
    %18 = vector.broadcast %15 : vector<128x1xf32> to vector<128x32xf32>
    %19 = arith.mulf %1, %18 : vector<128x32xf32>
    %cst_7 = arith.constant dense<0.000000e+00> : vector<8x128xf32>
    %20 = tpu.matmul %17, %19, %cst_7 {dimension_numbers = #tpu.dot_dimension_numbers<[1], [1], [0], [0], [0, 0, 1, 0], [], []>} : vector<8x32xf32>, vector<128x32xf32>, vector<8x128xf32> -> vector<8x128xf32>
    %c0_8 = arith.constant 0 : index
    %c0_9 = arith.constant 0 : index
    %21 = vector.load %arg4[%c0_8, %c0_9] : memref<8x128xf32, #tpu.memory_space<vmem>>, vector<8x128xf32>
    tpu.vector_store %arg4[%c0_8, %c0_9], %20 {strides = array<i32>} : memref<8x128xf32, #tpu.memory_space<vmem>>, vector<8x128xf32>,
    return
  }
  func.func @transform_0(%arg0: i32, %arg1: i32) -> (i32, i32) {
    %c0_i32 = arith.constant 0 : i32
    %c0_i32_0 = arith.constant 0 : i32
    return %arg0, %c0_i32 : i32, i32
  }
  func.func @transform_1(%arg0: i32, %arg1: i32) -> (i32, i32) {
    %c0_i32 = arith.constant 0 : i32
    %c0_i32_0 = arith.constant 0 : i32
    return %arg1, %c0_i32 : i32, i32
  }
  func.func @transform_2(%arg0: i32, %arg1: i32) -> (i32, i32) {
    %c0_i32 = arith.constant 0 : i32
    return %arg0, %arg1 : i32, i32
  }
}

</mosaic_0001>

<bundles_post_ra>
// kernel: tpu_custom_call.1
= control target key start
LH: loop header
LB: loop body
LE: loop exit
PB: predicated region body
PF: predicated region fallthrough
CT: control target
= control target key end

     0   :  { %vm30_vm0 = vcmask 261120   ;;  %s664_s0 = inlined_call_operand.vmem [shape: f32[8,32], index: 0, kind: input, shape index: {}]   ;;  %s665_s1 = inlined_call_operand.vmem [shape: f32[128,32], index: 1, kind: input, shape index: {}]   ;;  %s666_s2 = inlined_call_operand.hbm [shape: f32[8,128], index: 2, kind: output, shape index: {}]  }
   0x1   :  { %v471_v0 = vld [vmem:[%s665_s1] sm:$0xff]  ;;  %v476_v1 = vld [vmem:[%s665_s1 + $0x10] sm:$0xff]  ;;  %v481_v2 = vld [vmem:[%s665_s1 + $0x8] sm:$0xff] }
   0x2   :  { %v35_v3 = vmul.f32 %v471_v0, %v471_v0  ;;  %v37_v4 = vmul.f32 %v476_v1, %v476_v1  ;;  %v36_v5 = vmul.f32 %v481_v2, %v481_v2  ;;  %v492_v6 = vld [vmem:[%s665_s1 + $0x18] sm:$0xff]  ;;  %v499_v8 = vld [vmem:[%s665_s1 + $0x28] sm:$0xff]  ;;  %v504_v9 = vld [vmem:[%s665_s1 + $0x20] sm:$0xff] }
   0x3   :  { %v38_v7 = vmul.f32 %v492_v6, %v492_v6  ;;  %v40_v14 = vmul.f32 %v499_v8, %v499_v8  ;;  %v39_v15 = vmul.f32 %v504_v9, %v504_v9 }
   0x4   :  { %v51_v10 = vsel %vm30_vm0, %v35_v3, 0.0  ;;  %v57_v11 = vsel %vm30_vm0, %v37_v4, 0.0  ;;  %v54_v12 = vsel %vm30_vm0, %v36_v5, 0.0 }
   0x5   :  { %52 = vadd.xlane.f32.xlu0 %v51_v10  ;;  %58 = vadd.xlane.f32.xlu1 %v57_v11  ;;  %v60_v13 = vsel %vm30_vm0, %v38_v7, 0.0 }
   0x6   :  { %7 = vsyncpa [#allocation3], 0  ;;  %v517_v16 = vld [vmem:[%s665_s1 + $0x38] sm:$0xff]  ;;  %v522_v17 = vld [vmem:[%s665_s1 + $0x30] sm:$0xff]  ;;  %v66_v18 = vsel %vm30_vm0, %v40_v14, 0.0  ;;  %v63_v19 = vsel %vm30_vm0, %v39_v15, 0.0 }
   0x7   :  { %v42_v20 = vmul.f32 %v517_v16, %v517_v16  ;;  %v41_v21 = vmul.f32 %v522_v17, %v522_v17  ;;  %v533_v22 = vld [vmem:[%s665_s1 + $0x48] sm:$0xff]  ;;  %v538_v23 = vld [vmem:[%s665_s1 + $0x40] sm:$0xff]  ;;  %v549_v28 = vld [vmem:[%s665_s1 + $0x58] sm:$0xff]  ;;  %v449_v50 = vmov 0.0|0.0   ;;  %vm450_vm1 = vmmov 0  }
   0x8   :  { %v44_v26 = vmul.f32 %v533_v22, %v533_v22  ;;  %v43_v27 = vmul.f32 %v538_v23, %v538_v23  ;;  %v554_v29 = vld [vmem:[%s665_s1 + $0x50] sm:$0xff]  ;;  %v46_v32 = vmul.f32 %v549_v28, %v549_v28  ;;  %v565_v34 = vld [vmem:[%s665_s1 + $0x68] sm:$0xff]  ;;  %v570_v35 = vld [vmem:[%s665_s1 + $0x60] sm:$0xff]  ;;  %355 = vmatprep.subr.bf16.mxu0 %v449_v50  ;;  %v451_v52 = vmov 0.0  }
   0x9   :  { %55 = vadd.xlane.f32.xlu0 %v54_v12  ;;  %61 = vadd.xlane.f32.xlu1 %v60_v13  ;;  %v72_v24 = vsel %vm30_vm0, %v42_v20, 0.0  ;;  %v69_v25 = vsel %vm30_vm0, %v41_v21, 0.0  ;;  %v45_v33 = vmul.f32 %v554_v29, %v554_v29  ;;  %v48_v38 = vmul.f32 %v565_v34, %v565_v34  ;;  %v581_v40 = vld [vmem:[%s665_s1 + $0x78] sm:$0xff]  ;;  %v586_v41 = vld [vmem:[%s665_s1 + $0x70] sm:$0xff]  ;;  %v597_v46 = vld [vmem:[%s664_s0] sm:$0xff]  ;;  %s452_s0 = smov [#allocation2]  }
   0xa   :  { %v78_v30 = vsel %vm30_vm0, %v44_v26, 0.0  ;;  %v75_v31 = vsel %vm30_vm0, %v43_v27, 0.0  ;;  %v84_v36 = vsel %vm30_vm0, %v46_v32, 0.0  ;;  %v47_v39 = vmul.f32 %v570_v35, %v570_v35  ;;  %352 = vmatprep.mubr.msk.f32.mxu0 %vm450_vm1, %v451_v52  ;;  %vm609_vm2 = vmpackc.low %vm30_vm0, %vm30_vm0  ;;  %s278_s1 = sshll.u32 %s452_s0, 4  ;;  %s279_s1 = int_to_ptr.vmem [resolvable:$true] %s278_s1 }
   0xb   :  { %v81_v37 = vsel %vm30_vm0, %v45_v33, 0.0  ;;  %v90_v42 = vsel %vm30_vm0, %v48_v38, 0.0  ;;  %v50_v44 = vmul.f32 %v581_v40, %v581_v40  ;;  %v49_v45 = vmul.f32 %v586_v41, %v586_v41  ;;  %s425_s15 = scalar_lea.vmem %s279_s1, 128  ;;  %p430_p1 = scmp.lt.s32.totalorder %s279_s1, %s279_s1 }
   0xc   :  { %v87_v43 = vsel %vm30_vm0, %v47_v39, 0.0  ;;  %v29_v49 = vmul.f32 %v597_v46, %v597_v46  ;;  %p426_p0 = scmp.ne.s32.totalorder %s279_s1, %s425_s15  ;;  %p431_p2 = scmp.lt.s32.totalorder %s425_s15, %s425_s15 }
   0xd   :  { %67 = vadd.xlane.f32.xlu1 %v66_v18  ;;  %64 = vadd.xlane.f32.xlu0 %v63_v19  ;;  %v96_v47 = vsel %vm30_vm0, %v50_v44, 0.0  ;;  %v93_v48 = vsel %vm30_vm0, %v49_v45, 0.0 }
   0xe   :  { %v31_v51 = vsel %vm30_vm0, %v29_v49, 0.0  ;;  %p432_p3 = por %p431_p2, %p430_p1 }
  0x10   :  { %p433_p4 = pnand %p432_p3, %p426_p0 }
  0x11   :  { %73 = vadd.xlane.f32.xlu1 %v72_v24  ;;  %70 = vadd.xlane.f32.xlu0 %v69_v25 }
  0x15   :  { %79 = vadd.xlane.f32.xlu1 %v78_v30  ;;  %76 = vadd.xlane.f32.xlu0 %v75_v31 }
  0x19   :  { %85 = vadd.xlane.f32.xlu1 %v84_v36  ;;  %82 = vadd.xlane.f32.xlu0 %v81_v37 }
  0x1d   :  { %91 = vadd.xlane.f32.xlu1 %v90_v42  ;;  %88 = vadd.xlane.f32.xlu0 %v87_v43 }
  0x21   :  { %97 = vadd.xlane.f32.xlu1 %v96_v47  ;;  %94 = vadd.xlane.f32.xlu0 %v93_v48 }
  0x25   :  { %32 = vadd.xlane.f32.xlu0 %v31_v51 }
  0x92   :  { %v53_v53 = vpop.xlane.xlu0 %52  ;;  %v59_v54 = vpop.xlane.xlu1 %58 }
  0x93   :  { %v99_v55 = vmax.f32 %v53_v53, 1e-08  ;;  %v101_v59 = vmax.f32 %v59_v54, 1e-08 }
  0x95   :  { %391 = vrsqrt.f32 %v99_v55 }
  0x96   :  { %v56_v56 = vpop.xlane.xlu0 %55  ;;  %v62_v57 = vpop.xlane.xlu1 %61 }
  0x97   :  { %v100_v58 = vmax.f32 %v56_v56, 1e-08  ;;  %v102_v60 = vmax.f32 %v62_v57, 1e-08 }
  0x99   :  { %393 = vrsqrt.f32 %v100_v58 }
  0x9a   :  { %v68_v61 = vpop.xlane.xlu1 %67  ;;  %395 = vrsqrt.f32 %v101_v59  ;;  %v65_v62 = vpop.xlane.xlu0 %64 }
  0x9b   :  { %397 = vrsqrt.f32 %v102_v60  ;;  %v104_v63 = vmax.f32 %v68_v61, 1e-08  ;;  %v103_v3 = vmax.f32 %v65_v62, 1e-08 }
  0x9d   :  { %399 = vrsqrt.f32 %v104_v63 }
  0x9e   :  { %401 = vrsqrt.f32 %v103_v3  ;;  %v74_v7 = vpop.xlane.xlu1 %73  ;;  %v71_v12 = vpop.xlane.xlu0 %70 }
  0x9f   :  { %v392_v4 = vpop.eup %391  ;;  %v106_v18 = vmax.f32 %v74_v7, 1e-08  ;;  %v105_v20 = vmax.f32 %v71_v12, 1e-08 }
  0xa0   :  { %v134_v10 = vmul.f32 %v392_v4, %v471_v0 }
  0xa1   :  { %403 = vrsqrt.f32 %v106_v18 }
  0xa2   :  { %405 = vrsqrt.f32 %v105_v20  ;;  %v80_v21 = vpop.xlane.xlu1 %79  ;;  %v77_v25 = vpop.xlane.xlu0 %76 }
  0xa3   :  { %v394_v5 = vpop.eup %393  ;;  %v108_v30 = vmax.f32 %v80_v21, 1e-08  ;;  %v107_v31 = vmax.f32 %v77_v25, 1e-08 }
  0xa4   :  { %v135_v11 = vmul.f32 %v394_v5, %v481_v2  ;;  %v396_v14 = vpop.eup %395 }
  0xa5   :  { %v398_v19 = vpop.eup %397  ;;  %v136_v0 = vmul.f32 %v396_v14, %v476_v1  ;;  %407 = vrsqrt.f32 %v108_v30 }
  0xa6   :  { %v356_v15 = vpack.c.bf16 %v135_v11, %v134_v10  ;;  %v137_v2 = vmul.f32 %v398_v19, %v492_v6  ;;  %409 = vrsqrt.f32 %v107_v31  ;;  %v86_v1 = vpop.xlane.xlu1 %85  ;;  %v83_v37 = vpop.xlane.xlu0 %82 }
  0xa7   :  { %v400_v24 = vpop.eup %399  ;;  %v110_v39 = vmax.f32 %v86_v1, 1e-08  ;;  %v109_v42 = vmax.f32 %v83_v37, 1e-08 }
  0xa8   :  { %358 = vmatpush3.bf16.xpose.msk.msra.mxu0 %vm609_vm2, %v356_v15  ;;  %v402_v26 = vpop.eup %401  ;;  %v360_v27 = vpack.c.bf16 %v137_v2, %v136_v0  ;;  %v139_v33 = vmul.f32 %v400_v24, %v499_v8 }
  0xa9   :  { %359 = vmatprep.subr.bf16.mxu0 %v449_v50  ;;  %v138_v32 = vmul.f32 %v402_v26, %v504_v9  ;;  %411 = vrsqrt.f32 %v110_v39 }
  0xaa   :  { %413 = vrsqrt.f32 %v109_v42  ;;  %v92_v8 = vpop.xlane.xlu1 %91  ;;  %v89_v47 = vpop.xlane.xlu0 %88 }
  0xab   :  { %v404_v6 = vpop.eup %403  ;;  %v364_v36 = vpack.c.bf16 %v139_v33, %v138_v32  ;;  %v112_v49 = vmax.f32 %v92_v8, 1e-08  ;;  %v111_v51 = vmax.f32 %v89_v47, 1e-08 }
  0xac   :  { %v406_v38 = vpop.eup %405  ;;  %v141_v9 = vmul.f32 %v404_v6, %v517_v16 }
  0xad   :  { %v140_v43 = vmul.f32 %v406_v38, %v522_v17  ;;  %415 = vrsqrt.f32 %v112_v49 }
  0xae   :  { %417 = vrsqrt.f32 %v111_v51  ;;  %v98_v16 = vpop.xlane.xlu1 %97  ;;  %v95_v55 = vpop.xlane.xlu0 %94 }
  0xaf   :  { %v408_v44 = vpop.eup %407  ;;  %v368_v45 = vpack.c.bf16 %v141_v9, %v140_v43  ;;  %v114_v57 = vmax.f32 %v98_v16, 1e-08  ;;  %v113_v58 = vmax.f32 %v95_v55, 1e-08 }
  0xb0   :  { %362 = vmatpush3.bf16.xpose.msk.msra.mxu0 %vm609_vm2, %v360_v27  ;;  %v410_v48 = vpop.eup %409  ;;  %v143_v17 = vmul.f32 %v408_v44, %v533_v22 }
  0xb1   :  { %363 = vmatprep.subr.bf16.mxu0 %v449_v50  ;;  %v142_v52 = vmul.f32 %v410_v48, %v538_v23  ;;  %419 = vrsqrt.f32 %v114_v57 }
  0xb2   :  { %421 = vrsqrt.f32 %v113_v58  ;;  %v33_v22 = vpop.xlane.xlu0 %32 }
  0xb3   :  { %v412_v53 = vpop.eup %411  ;;  %v372_v54 = vpack.c.bf16 %v143_v17, %v142_v52  ;;  %v34_v63 = vmax.f32 %v33_v22, 1e-08 }
  0xb4   :  { %v414_v56 = vpop.eup %413  ;;  %v145_v23 = vmul.f32 %v412_v53, %v549_v28 }
  0xb5   :  { %v144_v59 = vmul.f32 %v414_v56, %v554_v29  ;;  %423 = vrsqrt.f32 %v34_v63 }
  0xb7   :  { %v416_v60 = vpop.eup %415  ;;  %v376_v61 = vpack.c.bf16 %v145_v23, %v144_v59 }
  0xb8   :  { %366 = vmatpush3.bf16.xpose.msk.msra.mxu0 %vm609_vm2, %v364_v36  ;;  %v418_v62 = vpop.eup %417  ;;  %v147_v4 = vmul.f32 %v416_v60, %v565_v34 }
  0xb9   :  { %367 = vmatprep.subr.bf16.mxu0 %v449_v50  ;;  %v146_v3 = vmul.f32 %v418_v62, %v570_v35 }
  0xbb   :  { %v420_v28 = vpop.eup %419  ;;  %v380_v29 = vpack.c.bf16 %v147_v4, %v146_v3 }
  0xbc   :  { %v422_v5 = vpop.eup %421  ;;  %v149_v10 = vmul.f32 %v420_v28, %v581_v40 }
  0xbd   :  { %v148_v7 = vmul.f32 %v422_v5, %v586_v41 }
  0xbf   :  { %v424_v11 = vpop.eup %423  ;;  %v384_v12 = vpack.c.bf16 %v149_v10, %v148_v7 }
  0xc0   :  { %370 = vmatpush3.bf16.xpose.msk.msra.mxu0 %vm609_vm2, %v368_v45  ;;  %v116_v35 = vmul.f32 20.0, %v424_v11 }
  0xc1   :  { %371 = vmatprep.subr.bf16.mxu0 %v449_v50 }
  0xc2   :  { %v133_v34 = vmul.f32 %v116_v35, %v597_v46 }
  0xc8   :  { %374 = vmatpush3.bf16.xpose.msk.msra.mxu0 %vm609_vm2, %v372_v54 }
  0xc9   :  { %375 = vmatprep.subr.bf16.mxu0 %v449_v50 }
  0xd0   :  { %378 = vmatpush3.bf16.xpose.msk.msra.mxu0 %vm609_vm2, %v376_v61 }
  0xd1   :  { %379 = vmatprep.subr.bf16.mxu0 %v449_v50 }
  0xd8   :  { %382 = vmatpush3.bf16.xpose.msk.msra.mxu0 %vm609_vm2, %v380_v29 }
  0xd9   :  { %383 = vmatprep.subr.bf16.mxu0 %v449_v50 }
  0xe0   :  { %386 = vmatpush3.bf16.xpose.msk.msra.mxu0 %vm609_vm2, %v384_v12 }
  0xe7   :  { %353 = vmatmul.mubr.msk.f32.vlgmr.msra.gmra.mrb[0].mxu0 %vm30_vm0, %v133_v34 }
 0x1ba   :  { %v267_v14 = vpop.f32.mrb[0].mxu0 }
 0x1bb   :  { %271 = vst [vmem:[#allocation2] sm:$0xff] %v267_v14  ;;  %v354_v41 = vpop.f32.mrb[1].mxu0 }
 0x1bc   :  { %436 = shalt.err (!%p433_p4)
}
 0x1bd   :  { %s437_s18 = scalar_lea.hbm %s666_s2, 128 }
 0x1be   :  { %p438_p5 = scmp.ne.s32.totalorder %s666_s2, %s437_s18  ;;  %p441_p6 = scmp.lt.u32.totalorder %s437_s18, %s666_s2 }
 0x1c0   :  { %p443_p7 = pnand %p441_p6, %p438_p5 }
 0x1c2   :  { %446 = shalt.err (!%p443_p7)
}
 0x1c3   :  { %281 = dma.vmem_to_hbm [thread:$0]  %s279_s1, 128, %s666_s2, [#allocation3]  }
 0x1c4   :  { %447 = dma.done.wait [#allocation3], 128  }
 0x1c5   :  { %448 = vsyncadd [#allocation3], 4294967168 }
 0x1c6   :  { %285 = vsyncpa [#allocation3], 1 }

</bundles_post_ra>
